<compile_context>
chip_gen: v6e
topology: v6e:2x2x1
jax: 0.10.0
libtpu: 0.0.40
codegen_flags: <defaults>
</compile_context>

<pallas_src>
import jax
import jax.numpy as jnp
from jax.experimental import pallas as pl
from jax.experimental.pallas import tpu as pltpu


def _rmsd_kernel(pred_ref, true_ref, cnt_ref, rmsd_ref):
    """One grid step handles a block of TB ligands.

    pred_ref : VMEM f32 (TB, N_pad)   flattened, zero-padded coordinates
    true_ref : VMEM f32 (TB, N_pad)
    cnt_ref  : VMEM i32 (TB, 1)       atom counts per ligand (0 for pad rows)
    rmsd_ref : VMEM f32 (TB, 1)       per-ligand RMSD output
    """
    diff = pred_ref[...] - true_ref[...]                      # (TB, N_pad) f32
    sq = diff * diff

    n = cnt_ref[...]                                          # (TB, 1) i32
    lane = jax.lax.broadcasted_iota(jnp.int32, sq.shape, 1)   # element index
    masked = jnp.where(lane < 3 * n, sq, jnp.float32(0.0))

    # sum over the 3*N valid elements == sum over atoms of per-atom sq dist.
    total = jnp.sum(masked, axis=1, keepdims=True)            # (TB, 1) f32
    # rmsd = sqrt( total / n_atoms ).  Padded rows (n == 0) give NaN and are
    # sliced away in the wrapper (matches PyTorch's NaN for empty ligands).
    rmsd_ref[...] = jnp.sqrt(total / n.astype(jnp.float32))


def _choose_block_rows(num_ligands, n_pad):
    # Keep 2 inputs x 2 pipeline buffers x TB x n_pad x 4 B within ~8 MiB so
    # the tile budget fits comfortably even on v7x's smaller scoped VMEM.
    budget_bytes = 8 * 1024 * 1024
    max_rows = max(8, budget_bytes // (n_pad * 4 * 4))
    if num_ligands <= max_rows:
        return max(8, ((num_ligands + 7) // 8) * 8)   # single block
    return max(128, (max_rows // 128) * 128)          # multi-block, lane-sized


def rmsd_fraction(pred, true, n_atoms, distance):
    """pred, true: f32 [B, N_max, 3] (padded); n_atoms: int32 [B].

    Returns (fraction_percent, per_ligand_rmsds).
    """
    B, N, C = pred.shape
    assert C == 3

    flat_len = N * C
    n_pad = ((flat_len + 127) // 128) * 128
    tb = _choose_block_rows(B, n_pad)
    b_pad = pl.cdiv(B, tb) * tb

    pred_f = jnp.pad(pred.reshape(B, flat_len).astype(jnp.float32),
                     ((0, b_pad - B), (0, n_pad - flat_len)))
    true_f = jnp.pad(true.reshape(B, flat_len).astype(jnp.float32),
                     ((0, b_pad - B), (0, n_pad - flat_len)))
    counts = jnp.pad(n_atoms.astype(jnp.int32), (0, b_pad - B)).reshape(b_pad, 1)

    rmsd_col = pl.pallas_call(
        _rmsd_kernel,
        out_shape=jax.ShapeDtypeStruct((b_pad, 1), jnp.float32),
        grid=(b_pad // tb,),
        in_specs=[
            pl.BlockSpec((tb, n_pad), lambda i: (i, 0)),
            pl.BlockSpec((tb, n_pad), lambda i: (i, 0)),
            pl.BlockSpec((tb, 1), lambda i: (i, 0)),
        ],
        out_specs=pl.BlockSpec((tb, 1), lambda i: (i, 0)),
        compiler_params=pltpu.CompilerParams(
            dimension_semantics=("parallel",)),
    )(pred_f, true_f, counts)

    rmsds = rmsd_col[:B, 0]
    # Threshold count + fraction: O(B) scalar epilogue, done in plain jnp.
    # Strict '<' as in the PyTorch module; NaN RMSDs (empty ligands) do not
    # count, matching PyTorch's NaN comparison behaviour.
    count = jnp.sum(rmsds < jnp.float32(distance)).astype(jnp.float32)
    frac = jnp.float32(100.0) * count / jnp.float32(B)
    return frac, rmsds


if __name__ == "__main__":
    key = jax.random.PRNGKey(0)
    B, N_MAX = 4, 16
    distance = 2.0

    # Variable-length ligands (the PyTorch module takes a list of [N_i, 3]
    # tensors); we pad to N_MAX and carry the lengths explicitly.
    n_atoms = jnp.array([16, 10, 7, 13], dtype=jnp.int32)

    k1, k2 = jax.random.split(key)
    true = jax.random.normal(k1, (B, N_MAX, 3), jnp.float32) * 5.0
    noise = jax.random.normal(k2, (B, N_MAX, 3), jnp.float32)
    # Different noise scales so some ligands fall below / above the threshold.
    scales = jnp.array([0.5, 3.0, 1.0, 4.0], jnp.float32).reshape(B, 1, 1)
    pred = true + noise * scales

    frac, rmsds = rmsd_fraction(pred, true, n_atoms, distance)
    jax.block_until_ready(frac)

    # Pure-JAX reference replicating the PyTorch list-of-tensors semantics.
    ref_rmsds = []
    for i in range(B):
        n = int(n_atoms[i])
        d = pred[i, :n] - true[i, :n]
        ref_rmsds.append(jnp.sqrt(jnp.mean(jnp.sum(d * d, axis=1))))
    ref_rmsds = jnp.stack(ref_rmsds)
    ref_frac = 100.0 * jnp.sum(ref_rmsds < distance).astype(jnp.float32) / B

    assert jnp.allclose(rmsds, ref_rmsds, atol=1e-5, rtol=1e-5), (rmsds, ref_rmsds)
    assert jnp.allclose(frac, ref_frac, atol=1e-5), (frac, ref_frac)

    print("KERNEL_OK")
</pallas_src>

<mosaic_0001>
module attributes {stable_mosaic.version = 11 : i64} {
  func.func @_rmsd_kernel(%arg0: i32, %arg1: memref<8x128xf32, #tpu.memory_space<vmem>>, %arg2: memref<8x128xf32, #tpu.memory_space<vmem>>, %arg3: memref<8x1xi32, #tpu.memory_space<vmem>>, %arg4: memref<8x1xf32, #tpu.memory_space<vmem>>) attributes {dimension_semantics = [#tpu.dimension_semantics<parallel>], iteration_bounds = array<i64: 1>, scalar_prefetch = 0 : i64, scratch_operands = 0 : i64, tpu.core_type = #tpu.core_type<tc>, window_params = [{transform_indices = @transform_0, window_bounds = array<i64: 8, 128>}, {transform_indices = @transform_1, window_bounds = array<i64: 8, 128>}, {transform_indices = @transform_2, window_bounds = array<i64: 8, 1>}, {transform_indices = @transform_3, window_bounds = array<i64: 8, 1>}]} {
    %c0 = arith.constant 0 : index
    %c0_0 = arith.constant 0 : index
    %0 = vector.load %arg1[%c0, %c0_0] : memref<8x128xf32, #tpu.memory_space<vmem>>, vector<8x128xf32>
    %c0_1 = arith.constant 0 : index
    %c0_2 = arith.constant 0 : index
    %1 = vector.load %arg2[%c0_1, %c0_2] : memref<8x128xf32, #tpu.memory_space<vmem>>, vector<8x128xf32>
    %2 = arith.subf %0, %1 : vector<8x128xf32>
    %3 = arith.mulf %2, %2 : vector<8x128xf32>
    %c0_3 = arith.constant 0 : index
    %c0_4 = arith.constant 0 : index
    %4 = vector.load %arg3[%c0_3, %c0_4] : memref<8x1xi32, #tpu.memory_space<vmem>>, vector<8x1xi32>
    %5 = tpu.iota {dimensions = array<i32: 1>} : vector<8x128xi32>
    %c3_i32 = arith.constant 3 : i32
    %6 = vector.broadcast %c3_i32 : i32 to vector<8x1xi32>
    %7 = arith.muli %6, %4 : vector<8x1xi32>
    %8 = vector.broadcast %7 : vector<8x1xi32> to vector<8x128xi32>
    %9 = arith.cmpi slt, %5, %8 : vector<8x128xi32>
    %cst = arith.constant 0.000000e+00 : f32
    %10 = vector.broadcast %cst : f32 to vector<8x128xf32>
    %11 = arith.select %9, %3, %10 : vector<8x128xi1>, vector<8x128xf32>
    %cst_5 = arith.constant dense<0.000000e+00> : vector<8xf32>
    %12 = vector.multi_reduction <add>, %11, %cst_5 [1] : vector<8x128xf32> to vector<8xf32>
    %13 = vector.shape_cast %12 : vector<8xf32> to vector<8x1xf32>
    %14 = arith.sitofp %4 : vector<8x1xi32> to vector<8x1xf32>
    %15 = arith.divf %13, %14 : vector<8x1xf32>
    %16 = math.sqrt %15 : vector<8x1xf32>
    %c0_6 = arith.constant 0 : index
    %c0_7 = arith.constant 0 : index
    %17 = vector.load %arg4[%c0_6, %c0_7] : memref<8x1xf32, #tpu.memory_space<vmem>>, vector<8x1xf32>
    tpu.vector_store %arg4[%c0_6, %c0_7], %16 {strides = array<i32>} : memref<8x1xf32, #tpu.memory_space<vmem>>, vector<8x1xf32>,
    return
  }
  func.func @transform_0(%arg0: i32) -> (i32, i32) {
    %c0_i32 = arith.constant 0 : i32
    %c0_i32_0 = arith.constant 0 : i32
    return %arg0, %c0_i32 : i32, i32
  }
  func.func @transform_1(%arg0: i32) -> (i32, i32) {
    %c0_i32 = arith.constant 0 : i32
    %c0_i32_0 = arith.constant 0 : i32
    return %arg0, %c0_i32 : i32, i32
  }
  func.func @transform_2(%arg0: i32) -> (i32, i32) {
    %c0_i32 = arith.constant 0 : i32
    %c0_i32_0 = arith.constant 0 : i32
    return %arg0, %c0_i32 : i32, i32
  }
  func.func @transform_3(%arg0: i32) -> (i32, i32) {
    %c0_i32 = arith.constant 0 : i32
    %c0_i32_0 = arith.constant 0 : i32
    return %arg0, %c0_i32 : i32, i32
  }
}

</mosaic_0001>

<bundles_post_ra>
// kernel: tpu_custom_call.1
= control target key start
LH: loop header
LB: loop body
LE: loop exit
PB: predicated region body
PF: predicated region fallthrough
CT: control target
= control target key end

     0   :  { %8 = vsyncpa [#allocation3], 0  ;;  %s87_s12 = smov [#allocation2]   ;;  %s121_s0 = inlined_call_operand.vmem [shape: f32[8,128], index: 0, kind: input, shape index: {}]   ;;  %s122_s1 = inlined_call_operand.hbm [shape: f32[8,128], index: 1, kind: input, shape index: {}]   ;;  %s123_s2 = inlined_call_operand.vmem [shape: s32[8,1], index: 2, kind: input, shape index: {}]   ;;  %s124_s3 = inlined_call_operand.vmem [shape: f32[8,1], index: 3, kind: output, shape index: {}]  }
   0x1   :  { %s17_s13 = sshll.u32 %s87_s12, 4  ;;  %s18_s13 = int_to_ptr.vmem [resolvable:$true] %s17_s13 }
   0x2   :  { %s73_s14 = scalar_lea.vmem %s18_s13, 128  ;;  %p78_p1 = scmp.lt.s32.totalorder %s18_s13, %s18_s13 }
   0x3   :  { %p74_p0 = scmp.ne.s32.totalorder %s18_s13, %s73_s14  ;;  %p79_p2 = scmp.lt.s32.totalorder %s73_s14, %s73_s14 }
   0x5   :  { %p80_p3 = por %p79_p2, %p78_p1 }
   0x7   :  { %p81_p4 = pnand %p80_p3, %p74_p0 }
   0x9   :  { %84 = shalt.err (!%p81_p4)
}
   0xa   :  { %20 = dma.hbm_to_vmem [thread:$0]  %s122_s1, 128, %s18_s13, [#allocation3]  }
   0xb   :  { %85 = dma.done.wait [#allocation3], 128  }
   0xc   :  { %86 = vsyncadd [#allocation3], 4294967168  ;;  %v88_v0 = vmov 0   ;;  %v30_v1 = vld [vmem:[%s123_s2] sm:$0xff]  ;;  %v31_v5 = vlaneseq  ;;  %vm51_vm1 = vcmask 7168  }
   0xd   :  { %60 = vset.pattern.permute.xlu0 %v88_v0  ;;  %v33_v2 = vmul.u32 3, %v30_v1  ;;  %v26_v3 = vld [vmem:[%s121_s0] sm:$0xff]  ;;  %v41_v11 = vcvt.s32.f32 %v30_v1 }
   0xe   :  { %v27_v4 = vld [vmem:[#allocation2] sm:$0xff]  ;;  %v32_v7 = vand.u32 127, %v31_v5 }
   0xf   :  { %35 = vperm.xlu0 %60, %v33_v2   ;;  %v28_v6 = vsub.f32 %v26_v3, %v27_v4  ;;  %61 = vrcp.f32 %v41_v11 }
  0x11   :  { %v29_v8 = vmul.f32 %v28_v6, %v28_v6 }
  0x1c   :  { %v62_v12 = vpop.eup %61 }
  0x8a   :  { %v36_v9 = vpop.permute.xlu0 %35 }
  0x8b   :  { %vm37_vm0 = vcmp.lt.s32.totalorder %v32_v7, %v36_v9 }
  0x8c   :  { %v38_v10 = vsel %vm37_vm0, %v29_v8, 0.0 }
  0x8d   :  { %39 = vadd.xlane.f32.xlu0 %v38_v10 }
 0x116   :  { %v40_v13 = vpop.xlane.xlu0 %39 }
 0x117   :  { %v43_v14 = vmul.f32 %v62_v12, %v40_v13 }
 0x119   :  { %63 = vrsqrt.f32 %v43_v14  ;;  %vm46_vm2 = vcmp.eq.f32.partialorder %v43_v14, inf  ;;  %v49_v17 = vand.u32 2147483648, %v43_v14  ;;  %vm48_vm3 = vcmp.eq.f32.partialorder %v43_v14, 0.0 }
 0x126   :  { %v64_v15 = vpop.eup %63 }
 0x127   :  { %v45_v16 = vmul.f32 %v64_v15, %v43_v14 }
 0x129   :  { %v47_v18 = vsel %vm46_vm2, %v43_v14, %v45_v16 }
 0x12a   :  { %v50_v19 = vsel %vm48_vm3, %v49_v17, %v47_v18 }
 0x12b   :  { %52 = vst.msk [vmem:[%s124_s3] sm:$0xff] %vm51_vm1, %v50_v19 }
 0x12c   :  { %57 = vsyncpa [#allocation3], 1 }

</bundles_post_ra>
